<compile_context>
chip_gen: v5e
topology: v5e:2x2
jax: 0.10.0
libtpu: 0.0.40
codegen_flags: <defaults>
</compile_context>

<pallas_src>
import jax
import jax.numpy as jnp
from jax.experimental import pallas as pl
from jax.experimental.pallas import tpu as pltpu

# Problem sizes (small, consistent with a Conv2d forward).
N, C_IN, H, W = 2, 4, 16, 16
C_OUT, KH, KW = 8, 3, 3
PAD = 1


def _conv_matmul_kernel(p_ref, w_ref, b_ref, o_ref):
    """Single im2col matmul + bias for one grid step.

    p_ref: (1, K, L)      im2col patches, lane-dense (L % 128 == 0)
    w_ref: (C_out, K)     flattened conv weight (tap-major, channel-minor)
    b_ref: (C_out, 1)     bias column
    o_ref: (1, C_out, L)  flattened output (lane-dense store)
    """
    o_ref[0] = (
        jnp.dot(w_ref[...], p_ref[0], preferred_element_type=jnp.float32)
        + b_ref[...]
    ).astype(o_ref.dtype)


def _batch_parallel_grid(n: int) -> bool:
    """True if the batch should stay a 'parallel' grid axis (multi-TC chips)."""
    if n <= 1:
        return False
    try:
        kind = jax.devices()[0].device_kind.lower()
    except Exception:
        return True  # safe default: batch-parallel grid is correct everywhere
    # v7x has 2 TensorCores per chip; v4/v5p expose a megacore.  Single-TC
    # inference chips (v5e / v6e) are better off with one fused grid step.
    return any(tag in kind for tag in ("v7", "7x", "v4", "v5p"))


def dummy_convolution_forward(x, weight, bias):
    """Forward pass of DummyConvolution wrapping a 3x3 pad-1 stride-1 Conv2d.

    x:      (N, C_in, H, W)        float32, NCHW
    weight: (C_out, C_in, KH, KW)  float32
    bias:   (C_out,)               float32
    returns (N, C_out, H, W)       float32
    """
    n, c_in, h, w = x.shape
    c_out, _, kh_sz, kw_sz = weight.shape
    k = kh_sz * kw_sz * c_in
    hw = h * w

    # --- glue (plain JAX): im2col + weight/bias reshape -----------------------
    x_pad = jnp.pad(x, ((0, 0), (0, 0), (PAD, PAD), (PAD, PAD)))
    taps = [
        x_pad[:, :, kh:kh + h, kw:kw + w]
        for kh in range(kh_sz)
        for kw in range(kw_sz)
    ]
    # (n, KH*KW, C_in, H, W) -> (n, K, H*W); tap-major, channel-minor ordering.
    patches = jnp.stack(taps, axis=1).reshape(n, k, hw)
    # Matching (C_out, K) weight: (o, c, kh, kw) -> (o, kh, kw, c) -> flatten.
    w_mat = jnp.transpose(weight, (0, 2, 3, 1)).reshape(c_out, k)
    b_col = bias.reshape(c_out, 1)

    batch_in_grid = _batch_parallel_grid(n)
    if batch_in_grid:
        blocks, lane = n, hw            # one batch element per (parallel) grid step
        p_in = patches
    else:
        blocks, lane = 1, n * hw        # fold batch into lanes: 1 step, N*H*W lanes
        p_in = jnp.transpose(patches, (1, 0, 2)).reshape(1, k, n * hw)

    # NOTE: at these sizes VMEM is a non-issue; a scaled-up variant must re-derive
    # block shapes against v7x's 64 MiB VMEM (or set vmem_limit_bytes explicitly).
    out_flat = pl.pallas_call(
        _conv_matmul_kernel,
        out_shape=jax.ShapeDtypeStruct((blocks, c_out, lane), jnp.float32),
        grid_spec=pltpu.PrefetchScalarGridSpec(
            num_scalar_prefetch=0,
            grid=(blocks,),
            in_specs=[
                pl.BlockSpec((1, k, lane), lambda b: (b, 0, 0)),
                pl.BlockSpec((c_out, k), lambda b: (0, 0)),
                pl.BlockSpec((c_out, 1), lambda b: (0, 0)),
            ],
            out_specs=pl.BlockSpec((1, c_out, lane), lambda b: (b, 0, 0)),
        ),
        compiler_params=pltpu.CompilerParams(
            dimension_semantics=("parallel",),
        ),
    )(p_in, w_mat, b_col)

    if batch_in_grid:
        return out_flat.reshape(n, c_out, h, w)
    # folded layout: (1, C_out, n*H*W) -> (C_out, n, H*W) -> (n, C_out, H, W)
    return jnp.transpose(out_flat.reshape(c_out, n, hw), (1, 0, 2)).reshape(
        n, c_out, h, w
    )


if __name__ == "__main__":
    key = jax.random.PRNGKey(0)
    kx, kw_, kb = jax.random.split(key, 3)

    # Deterministic synthetic inputs / parameters (no checkpoint load).
    x = jax.random.normal(kx, (N, C_IN, H, W), dtype=jnp.float32)
    weight = jax.random.normal(kw_, (C_OUT, C_IN, KH, KW), dtype=jnp.float32) * 0.1
    bias = jax.random.normal(kb, (C_OUT,), dtype=jnp.float32) * 0.1

    out = dummy_convolution_forward(x, weight, bias)
    out = jax.block_until_ready(out)

    # Reference check against XLA conv (NCHW / OIHW, same padding semantics).
    ref = jax.lax.conv_general_dilated(
        x, weight, window_strides=(1, 1), padding=((PAD, PAD), (PAD, PAD)),
        dimension_numbers=("NCHW", "OIHW", "NCHW"),
    ) + bias.reshape(1, C_OUT, 1, 1)

    assert out.shape == (N, C_OUT, H, W)
    assert jnp.allclose(out, ref, atol=1e-4, rtol=1e-4)

    print("KERNEL_OK")
</pallas_src>

<mosaic_0001>
module attributes {stable_mosaic.version = 11 : i64} {
  func.func @_conv_matmul_kernel(%arg0: i32, %arg1: memref<1x36x512xf32, #tpu.memory_space<vmem>>, %arg2: memref<8x36xf32, #tpu.memory_space<vmem>>, %arg3: memref<8x1xf32, #tpu.memory_space<vmem>>, %arg4: memref<1x8x512xf32, #tpu.memory_space<vmem>>) attributes {dimension_semantics = [#tpu.dimension_semantics<parallel>], iteration_bounds = array<i64: 1>, scalar_prefetch = 0 : i64, scratch_operands = 0 : i64, tpu.core_type = #tpu.core_type<tc>, window_params = [{transform_indices = @transform_0, window_bounds = array<i64: 1, 36, 512>}, {pipeline_mode = #tpu.pipeline_mode<synchronous>, transform_indices = @transform_1, window_bounds = array<i64: 8, 36>}, {pipeline_mode = #tpu.pipeline_mode<synchronous>, transform_indices = @transform_2, window_bounds = array<i64: 8, 1>}, {transform_indices = @transform_3, window_bounds = array<i64: 1, 8, 512>}]} {
    %c0 = arith.constant 0 : index
    %c0_0 = arith.constant 0 : index
    %0 = vector.load %arg2[%c0, %c0_0] : memref<8x36xf32, #tpu.memory_space<vmem>>, vector<8x36xf32>
    %c0_1 = arith.constant 0 : index
    %c0_2 = arith.constant 0 : index
    %c0_3 = arith.constant 0 : index
    %1 = vector.load %arg1[%c0_1, %c0_2, %c0_3] : memref<1x36x512xf32, #tpu.memory_space<vmem>>, vector<1x36x512xf32>
    %2 = vector.shape_cast %1 : vector<1x36x512xf32> to vector<36x512xf32>
    %cst = arith.constant dense<0.000000e+00> : vector<8x512xf32>
    %3 = tpu.matmul %0, %2, %cst {dimension_numbers = #tpu.dot_dimension_numbers<[1], [0], [0], [1], [0, 0, 1, 1], [], []>} : vector<8x36xf32>, vector<36x512xf32>, vector<8x512xf32> -> vector<8x512xf32>
    %c0_4 = arith.constant 0 : index
    %c0_5 = arith.constant 0 : index
    %4 = vector.load %arg3[%c0_4, %c0_5] : memref<8x1xf32, #tpu.memory_space<vmem>>, vector<8x1xf32>
    %5 = vector.broadcast %4 : vector<8x1xf32> to vector<8x512xf32>
    %6 = arith.addf %3, %5 : vector<8x512xf32>
    %c0_6 = arith.constant 0 : index
    %c0_7 = arith.constant 0 : index
    %c0_8 = arith.constant 0 : index
    %7 = vector.load %arg4[%c0_6, %c0_7, %c0_8] : memref<1x8x512xf32, #tpu.memory_space<vmem>>, vector<1x8x512xf32>
    %8 = vector.shape_cast %7 : vector<1x8x512xf32> to vector<8x512xf32>
    %9 = vector.shape_cast %6 : vector<8x512xf32> to vector<1x8x512xf32>
    tpu.vector_store %arg4[%c0_6, %c0_7, %c0_8], %9 {strides = array<i32>} : memref<1x8x512xf32, #tpu.memory_space<vmem>>, vector<1x8x512xf32>,
    return
  }
  func.func @transform_0(%arg0: i32) -> (i32, i32, i32) {
    %c0_i32 = arith.constant 0 : i32
    %c0_i32_0 = arith.constant 0 : i32
    %c0_i32_1 = arith.constant 0 : i32
    return %arg0, %c0_i32, %c0_i32_0 : i32, i32, i32
  }
  func.func @transform_1(%arg0: i32) -> (i32, i32) {
    %c0_i32 = arith.constant 0 : i32
    %c0_i32_0 = arith.constant 0 : i32
    %c0_i32_1 = arith.constant 0 : i32
    return %c0_i32, %c0_i32_0 : i32, i32
  }
  func.func @transform_2(%arg0: i32) -> (i32, i32) {
    %c0_i32 = arith.constant 0 : i32
    %c0_i32_0 = arith.constant 0 : i32
    %c0_i32_1 = arith.constant 0 : i32
    return %c0_i32, %c0_i32_0 : i32, i32
  }
  func.func @transform_3(%arg0: i32) -> (i32, i32, i32) {
    %c0_i32 = arith.constant 0 : i32
    %c0_i32_0 = arith.constant 0 : i32
    %c0_i32_1 = arith.constant 0 : i32
    return %arg0, %c0_i32, %c0_i32_0 : i32, i32, i32
  }
}

</mosaic_0001>

<bundles_post_ra>
// kernel: tpu_custom_call.1
= control target key start
LH: loop header
LB: loop body
LE: loop exit
PB: predicated region body
PF: predicated region fallthrough
CT: control target
= control target key end

     0   :  { %vm46_vm0 = vcmask 1043456   ;;  %v196_v8 = vmov 0   ;;  %vm42_vm1 = vcmask 293888   ;;  %s295_s0 = inlined_call_operand.vmem [shape: f32[1,36,512], index: 0, kind: input, shape index: {}]   ;;  %s296_s1 = inlined_call_operand.vmem [shape: f32[8,36], index: 1, kind: input, shape index: {}]   ;;  %s297_s2 = inlined_call_operand.vmem [shape: f32[8,1], index: 2, kind: input, shape index: {}]   ;;  %s298_s3 = inlined_call_operand.hbm [shape: f32[1,8,512], index: 3, kind: output, shape index: {}]  }
   0x1   :  { %v34_v0 = vld [vmem:[%s295_s0 + $0x90] sm:$0xf]  ;;  %v35_v1 = vld [vmem:[%s295_s0 + $0x98] sm:$0xf]  ;;  %v32_v6 = vld [vmem:[%s295_s0 + $0x80] sm:$0xf]  ;;  %169 = vset.pattern.permute.xlu0 %v196_v8 }
   0x2   :  { %v30_v2 = vld [vmem:[%s295_s0 + $0x70] sm:$0xff]  ;;  %163 = vmatpush.msk.msra.mxu2 %vm46_vm0, %v34_v0  ;;  %165 = vmatpush.msk.msra.mxu3 %vm46_vm0, %v35_v1  ;;  %v31_v3 = vld [vmem:[%s295_s0 + $0x78] sm:$0xff]  ;;  %v33_v7 = vld [vmem:[%s295_s0 + $0x88] sm:$0xf] }
   0x3   :  { %v26_v4 = vld [vmem:[%s295_s0 + $0x50] sm:$0xff]  ;;  %v27_v5 = vld [vmem:[%s295_s0 + $0x58] sm:$0xff]  ;;  %v28_v9 = vld [vmem:[%s295_s0 + $0x60] sm:$0xff]  ;;  %159 = vmatpush.msk.msra.mxu0 %vm46_vm0, %v32_v6  ;;  %161 = vmatpush.msk.msra.mxu1 %vm46_vm0, %v33_v7 }
   0x4   :  { %111 = vmatpush.msra.mxu2 %v30_v2  ;;  %131 = vmatpush.msra.mxu3 %v31_v3  ;;  %v29_v10 = vld [vmem:[%s295_s0 + $0x68] sm:$0xff]  ;;  %v22_v11 = vld [vmem:[%s295_s0 + $0x30] sm:$0xff]  ;;  %v23_v12 = vld [vmem:[%s295_s0 + $0x38] sm:$0xff] }
   0x5   :  { %v24_v13 = vld [vmem:[%s295_s0 + $0x40] sm:$0xff]  ;;  %v25_v14 = vld [vmem:[%s295_s0 + $0x48] sm:$0xff]  ;;  %71 = vmatpush.msra.mxu0 %v28_v9  ;;  %91 = vmatpush.msra.mxu1 %v29_v10  ;;  %v18_v15 = vld [vmem:[%s295_s0 + $0x10] sm:$0xff] }
   0x6   :  { %112 = vmatpush.msra.mxu2 %v26_v4  ;;  %132 = vmatpush.msra.mxu3 %v27_v5  ;;  %v19_v16 = vld [vmem:[%s295_s0 + $0x18] sm:$0xff]  ;;  %v15_v17 = vld [vmem:[%s296_s1] sm:$0xff] }
   0x8   :  { %113 = vmatpush.msra.mxu2 %v22_v11  ;;  %133 = vmatpush.msra.mxu3 %v23_v12 }
   0x9   :  { %8 = vsyncpa [#allocation3], 0  ;;  %72 = vmatpush.msra.mxu0 %v24_v13  ;;  %92 = vmatpush.msra.mxu1 %v25_v14  ;;  %v20_v18 = vld [vmem:[%s295_s0 + $0x20] sm:$0xff]  ;;  %v21_v19 = vld [vmem:[%s295_s0 + $0x28] sm:$0xff] }
   0xa   :  { %114 = vmatpush.msra.mxu2 %v18_v15  ;;  %134 = vmatpush.msra.mxu3 %v19_v16  ;;  %v36_v20 = vld [vmem:[%s297_s2] sm:$0xff]  ;;  %v17_v22 = vld [vmem:[%s295_s0 + $0x8] sm:$0xff]  ;;  %s197_s2 = smov [#allocation2]  }
   0xb   :  { %164 = vmatmul.msk.f32.vlgmr.msra.gmra.mxu2 %vm42_vm1, %v15_v17  ;;  %166 = vmatmul.msk.f32.vlgmr.msra.gmra.mxu3 %vm42_vm1, %v15_v17  ;;  %v16_v21 = vld [vmem:[%s295_s0] sm:$0xff]  ;;  %s148_s28 = sshll.u32 %s197_s2, 4  ;;  %s150_s0 = sshll.u32 %s298_s3, 4  ;;  %s149_s28 = int_to_ptr.vmem [resolvable:$true] %s148_s28  ;;  %s151_s0 = int_to_ptr.hbm [resolvable:$true] %s150_s0 }
   0xc   :  { %73 = vmatpush.msra.mxu0 %v20_v18  ;;  %93 = vmatpush.msra.mxu1 %v21_v19 }
   0xd   :  { %39 = vperm.xlu0 %169, %v36_v20  }
   0xe   :  { %74 = vmatpush.msra.mxu0 %v16_v21  ;;  %94 = vmatpush.msra.mxu1 %v17_v22 }
   0xf   :  { %160 = vmatmul.msk.f32.vlgmr.msra.gmra.mxu0 %vm42_vm1, %v15_v17  ;;  %162 = vmatmul.msk.f32.vlgmr.msra.gmra.mxu1 %vm42_vm1, %v15_v17 }
  0x7f   :  { %v40_v23 = vpop.permute.xlu0 %39 }
  0x8c   :  { %v76_v24 = vpop.f32.mrf.mxu0  ;;  %v96_v25 = vpop.f32.mrf.mxu1 }
  0x8d   :  { %v77_v26 = vadd.f32 %v76_v24, %v40_v23  ;;  %v97_v27 = vadd.f32 %v96_v25, %v40_v23 }
  0x8e   :  { %v116_v28 = vpop.f32.mrf.mxu2  ;;  %v136_v29 = vpop.f32.mrf.mxu3 }
  0x8f   :  { %139 = vst [vmem:[#allocation2] sm:$0xff] %v77_v26  ;;  %v117_v30 = vadd.f32 %v116_v28, %v40_v23  ;;  %v137_v31 = vadd.f32 %v136_v29, %v40_v23 }
  0x90   :  { %140 = vst [vmem:[#allocation2 + $0x8] sm:$0xff] %v97_v27 }
  0x91   :  { %141 = vst [vmem:[#allocation2 + $0x10] sm:$0xff] %v117_v30 }
  0x92   :  { %142 = vst [vmem:[#allocation2 + $0x18] sm:$0xff] %v137_v31 }
  0x93   :  { %153 = dma.vmem_to_hbm [thread:$0]  %s149_s28, 512, %s151_s0, [#allocation3]  }
  0x94   :  { %194 = dma.done.wait [#allocation3], 512  }
  0x95   :  { %195 = vsyncadd [#allocation3], 4294966784 }
  0x96   :  { %158 = vsyncpa [#allocation3], 1 }

</bundles_post_ra>
